<compile_context>
chip_gen: v7x
topology: tpu7x:2x2x1
jax: 0.10.0
libtpu: 0.0.40
codegen_flags: <defaults>
</compile_context>

<pallas_src>
from functools import partial

import numpy as np
import jax
import jax.numpy as jnp
from jax.experimental import pallas as pl
from jax.experimental.pallas import tpu as pltpu


# ----------------------------------------------------------------------------
# Parameter setup (deterministic, in-script; mirrors the PyTorch module init)
# ----------------------------------------------------------------------------
def init_params(key):
    ks = jax.random.split(key, 10)

    def u(k, shape, fan_in):
        bound = 1.0 / np.sqrt(fan_in)
        return jax.random.uniform(k, shape, jnp.float32, -bound, bound)

    w1 = u(ks[0], (16, 32, 3, 3), 32 * 9); b1 = u(ks[1], (16,), 32 * 9)
    w2 = u(ks[2], (8, 16, 3, 3), 16 * 9);  b2 = u(ks[3], (8,), 16 * 9)
    w3 = u(ks[4], (8, 8, 3, 3),  8 * 9);   b3 = u(ks[5], (8,), 8 * 9)
    wd1 = u(ks[6], (9, 72), 72);           bd1 = u(ks[7], (9,), 72)
    wd2 = u(ks[8], (1, 72), 72);           bd2 = u(ks[9], (1,), 72)
    return (w1, b1, w2, b2, w3, b3, wd1, bd1, wd2, bd2)


def lower_conv_to_dense(w):
    """Lower a 3x3 'same' conv on a 3x3 board to a dense [Cin*9, Cout*9] matrix.

    out_flat[co*9 + i*3 + j] = sum_in M[in_idx, out_idx] * x_flat[in_idx]
    reproduces F.conv2d(x, w, padding=1) exactly (channel-major flattening).
    """
    w = np.asarray(w)
    Cout, Cin, _, _ = w.shape
    H = W = 3
    M = np.zeros((Cin * H * W, Cout * H * W), np.float32)
    for co in range(Cout):
        for i in range(H):
            for j in range(W):
                out_idx = co * 9 + i * 3 + j
                for ci in range(Cin):
                    for ki in range(3):
                        for kj in range(3):
                            ii, jj = i + ki - 1, j + kj - 1
                            if 0 <= ii < H and 0 <= jj < W:
                                M[ci * 9 + ii * 3 + jj, out_idx] = w[co, ci, ki, kj]
    return M


def prepare_params(params, compute_dtype=jnp.bfloat16):
    """Host-side, ONCE per weight set: lower convs to dense, pad lanes to multiples
    of 128, pack into 3 slabs.  Pure function of the weights."""
    w1, b1, w2, b2, w3, b3, wd1, bd1, wd2, bd2 = params

    m1 = lower_conv_to_dense(w1)   # [288, 144]
    m2 = lower_conv_to_dense(w2)   # [144,  72]
    m3 = lower_conv_to_dense(w3)   # [ 72,  72]

    # Layer 1: [288, 256] (K = 288 stays unpadded — sublane aligned; N 144->256 zero cols)
    m1p = np.zeros((288, 256), np.float32); m1p[:, :144] = m1
    # Layer 2: [256, 128]
    m2p = np.zeros((256, 128), np.float32); m2p[:144, :72] = m2
    # Layer 3: [128, 128]
    m3p = np.zeros((128, 128), np.float32); m3p[:72, :72] = m3
    # Fused head: columns 0-8 = dense1 (policy logits), column 9 = dense2 (value)
    whp = np.zeros((128, 128), np.float32)
    whp[:72, :9] = np.asarray(wd1).T
    whp[:72, 9] = np.asarray(wd2)[0]
    m_rest = np.concatenate([m2p, m3p, whp], axis=0)      # [512, 128]

    # Bias slab [4, 256]: row0=conv1, row1=conv2, row2=conv3, row3=head; padded lanes 0.
    bias = np.zeros((4, 256), np.float32)
    bias[0, :144] = np.repeat(np.asarray(b1), 9)
    bias[1, :72] = np.repeat(np.asarray(b2), 9)
    bias[2, :72] = np.repeat(np.asarray(b3), 9)
    bias[3, :9] = np.asarray(bd1)
    bias[3, 9] = float(np.asarray(bd2)[0])

    return (jnp.asarray(m1p, compute_dtype),
            jnp.asarray(m_rest, compute_dtype),
            jnp.asarray(bias, jnp.float32))


def _has_two_tensorcores():
    kind = jax.devices()[0].device_kind.lower()
    return ("v7" in kind) or ("7x" in kind)


def _round_up(n, m):
    return ((n + m - 1) // m) * m


_TILE_CAP = 512  # rows; VMEM use at 512 rows is well under the scoped default everywhere


def _select_tile_b(B, two_tc):
    """Pick a batch tile.  Legal blocks: tile == B (full dim) or tile % 8 == 0 and tile <= B."""
    if two_tc and B >= 64:
        # keep >= 2 grid steps so the "parallel" batch axis shards across both TCs
        return min(_TILE_CAP, _round_up((B + 1) // 2, 8))
    if B <= _TILE_CAP:
        return B                       # single full-batch block (incl. tiny-batch fast path)
    return _TILE_CAP                   # multiple of 8 <= B; last block may be partial


# ----------------------------------------------------------------------------
# Pallas kernel: 4 matmuls + relu + masked softmax + tanh for one batch tile
# ----------------------------------------------------------------------------
def prediction_kernel(x_ref, m1_ref, mrest_ref, bias_ref, out_ref):
    cdt = m1_ref.dtype                                     # bf16 MXU operand dtype

    x = x_ref[...]                                         # [TB, 288] bf16 (cast in wrapper)
    h = jnp.dot(x, m1_ref[...], preferred_element_type=jnp.float32)
    h = jnp.maximum(h + bias_ref[0:1, :], 0.0)             # [TB, 256] f32

    h = jnp.dot(h.astype(cdt), mrest_ref[0:256, :], preferred_element_type=jnp.float32)
    h = jnp.maximum(h + bias_ref[1:2, 0:128], 0.0)         # [TB, 128]

    h = jnp.dot(h.astype(cdt), mrest_ref[256:384, :], preferred_element_type=jnp.float32)
    h = jnp.maximum(h + bias_ref[2:3, 0:128], 0.0)         # [TB, 128]

    head = jnp.dot(h.astype(cdt), mrest_ref[384:512, :], preferred_element_type=jnp.float32)
    head = head + bias_ref[3:4, 0:128]                     # [TB, 128]

    lane = jax.lax.broadcasted_iota(jnp.int32, head.shape, 1)
    # policy: softmax over lanes 0..8 only (padded lanes masked very negative -> exp ~ 0)
    logits = jnp.where(lane < 9, head, -1e30)
    m = jnp.max(logits, axis=-1, keepdims=True)
    e = jnp.exp(logits - m)
    probs = e * pl.reciprocal(jnp.sum(e, axis=-1, keepdims=True), approx=True)
    # value: tanh of lane 9
    val = jnp.tanh(head)

    out_ref[...] = jnp.where(lane < 9, probs,
                             jnp.where(lane == 9, val, 0.0))


@partial(jax.jit, static_argnames=("tile_b",))
def _run_pallas(x, m1, m_rest, bias, tile_b):
    B = x.shape[0]
    return pl.pallas_call(
        prediction_kernel,
        out_shape=jax.ShapeDtypeStruct((B, 128), jnp.float32),
        grid_spec=pltpu.PrefetchScalarGridSpec(
            num_scalar_prefetch=0,
            grid=(pl.cdiv(B, tile_b),),
            in_specs=[
                pl.BlockSpec((tile_b, 288), lambda i: (i, 0)),   # activations (tiled, bf16)
                pl.BlockSpec((288, 256), lambda i: (0, 0)),      # conv1 dense (VMEM resident)
                pl.BlockSpec((512, 128), lambda i: (0, 0)),      # conv2|conv3|head slab
                pl.BlockSpec((4, 256), lambda i: (0, 0)),        # bias slab (f32)
            ],
            out_specs=pl.BlockSpec((tile_b, 128), lambda i: (i, 0)),
        ),
        compiler_params=pltpu.CompilerParams(
            dimension_semantics=("parallel",)),                  # v7x: split batch over TCs
    )(x, m1, m_rest, bias)


def prediction_forward_batched(states, prepared, tile_b=None):
    """states: [B, 32, 3, 3] f32 -> (policy [B, 9], value [B, 1])"""
    m1, m_rest, bias = prepared
    B = states.shape[0]
    if tile_b is None:
        tile_b = _select_tile_b(B, _has_two_tensorcores())
    # Single fused pass: CHW-major flatten + f32->bf16 cast.  No padded batch copy.
    x = states.reshape(B, 32 * 9).astype(m1.dtype)           # [B, 288] bf16
    out = _run_pallas(x, m1, m_rest, bias, int(tile_b))
    return out[:, :9], out[:, 9:10]


def prediction_forward(state, prepared):
    """Single-board API matching the PyTorch module: [32,3,3] -> ([9], [1])."""
    policy, value = prediction_forward_batched(state[None], prepared)
    return policy[0], value[0]


# ----------------------------------------------------------------------------
# Pure-JAX reference (mirrors the PyTorch forward) for a correctness check
# ----------------------------------------------------------------------------
def reference_forward(state, params):
    w1, b1, w2, b2, w3, b3, wd1, bd1, wd2, bd2 = params

    def conv_relu(x, w, b):
        y = jax.lax.conv_general_dilated(
            x[None], w, (1, 1), 'SAME',
            dimension_numbers=('NCHW', 'OIHW', 'NCHW'))[0]
        return jax.nn.relu(y + b[:, None, None])

    h = conv_relu(state, w1, b1)
    h = conv_relu(h, w2, b2)
    h = conv_relu(h, w3, b3)
    hf = h.reshape(1, -1)
    policy = jax.nn.softmax(hf @ wd1.T + bd1[None, :], axis=-1)[0]
    value = jnp.tanh(hf @ wd2.T + bd2[None, :])[0]
    return policy, value


if __name__ == "__main__":
    key = jax.random.PRNGKey(0)
    k_state, k_params = jax.random.split(key)

    params = init_params(k_params)
    prepared = prepare_params(params)     # bf16 MXU operands on every TPU generation

    rtol, atol = 5e-2, 2e-2               # bf16 operand tolerance

    # 1) Small batch: single full-batch block, grid = 1
    B = 4
    states = jax.random.normal(k_state, (B, 32, 3, 3), jnp.float32)
    policy, value = prediction_forward_batched(states, prepared)
    jax.block_until_ready((policy, value))
    ref_p, ref_v = jax.vmap(reference_forward, in_axes=(0, None))(states, params)
    assert policy.shape == (B, 9) and value.shape == (B, 1)
    assert np.allclose(np.asarray(policy), np.asarray(ref_p), rtol=rtol, atol=atol)
    assert np.allclose(np.asarray(value), np.asarray(ref_v), rtol=rtol, atol=atol)
    assert np.allclose(np.asarray(policy).sum(-1), 1.0, atol=2e-2)

    # 2) Multi-step grid with a partial boundary block (B=20, tile=8 -> grid=3, last block ragged)
    B2 = 20
    states2 = jax.random.normal(jax.random.PRNGKey(1), (B2, 32, 3, 3), jnp.float32)
    p2, v2 = prediction_forward_batched(states2, prepared, tile_b=8)
    jax.block_until_ready((p2, v2))
    ref_p2, ref_v2 = jax.vmap(reference_forward, in_axes=(0, None))(states2, params)
    assert p2.shape == (B2, 9) and v2.shape == (B2, 1)
    assert np.allclose(np.asarray(p2), np.asarray(ref_p2), rtol=rtol, atol=atol)
    assert np.allclose(np.asarray(v2), np.asarray(ref_v2), rtol=rtol, atol=atol)

    # 3) Single-board path (matches the PyTorch module signature); tiny full-dim block
    p1, v1 = prediction_forward(states[0], prepared)
    jax.block_until_ready((p1, v1))
    assert p1.shape == (9,) and v1.shape == (1,)
    assert np.allclose(np.asarray(p1), np.asarray(ref_p[0]), rtol=rtol, atol=atol)
    assert np.allclose(np.asarray(v1), np.asarray(ref_v[0]), rtol=rtol, atol=atol)

    print("KERNEL_OK")
</pallas_src>

<mosaic_0001>
module attributes {stable_mosaic.version = 11 : i64} {
  func.func @prediction_kernel(%arg0: i32, %arg1: memref<4x288xbf16, #tpu.memory_space<vmem>>, %arg2: memref<288x256xbf16, #tpu.memory_space<vmem>>, %arg3: memref<512x128xbf16, #tpu.memory_space<vmem>>, %arg4: memref<4x256xf32, #tpu.memory_space<vmem>>, %arg5: memref<4x128xf32, #tpu.memory_space<vmem>>) attributes {dimension_semantics = [#tpu.dimension_semantics<parallel>], iteration_bounds = array<i64: 1>, scalar_prefetch = 0 : i64, scratch_operands = 0 : i64, tpu.core_type = #tpu.core_type<tc>, window_params = [{transform_indices = @transform_0, window_bounds = array<i64: 4, 288>}, {pipeline_mode = #tpu.pipeline_mode<synchronous>, transform_indices = @transform_1, window_bounds = array<i64: 288, 256>}, {pipeline_mode = #tpu.pipeline_mode<synchronous>, transform_indices = @transform_2, window_bounds = array<i64: 512, 128>}, {pipeline_mode = #tpu.pipeline_mode<synchronous>, transform_indices = @transform_3, window_bounds = array<i64: 4, 256>}, {transform_indices = @transform_4, window_bounds = array<i64: 4, 128>}]} {
    %c0 = arith.constant 0 : index
    %c0_0 = arith.constant 0 : index
    %0 = vector.load %arg1[%c0, %c0_0] : memref<4x288xbf16, #tpu.memory_space<vmem>>, vector<4x288xbf16>
    %c0_1 = arith.constant 0 : index
    %c0_2 = arith.constant 0 : index
    %1 = vector.load %arg2[%c0_1, %c0_2] : memref<288x256xbf16, #tpu.memory_space<vmem>>, vector<288x256xbf16>
    %cst = arith.constant dense<0.000000e+00> : vector<4x256xf32>
    %2 = tpu.matmul %0, %1, %cst {dimension_numbers = #tpu.dot_dimension_numbers<[1], [0], [0], [1], [0, 0, 1, 1], [], []>} : vector<4x288xbf16>, vector<288x256xbf16>, vector<4x256xf32> -> vector<4x256xf32>
    %c0_3 = arith.constant 0 : index
    %c0_4 = arith.constant 0 : index
    %3 = vector.load %arg4[%c0_3, %c0_4] : memref<4x256xf32, #tpu.memory_space<vmem>>, vector<1x256xf32>
    %4 = vector.broadcast %3 : vector<1x256xf32> to vector<4x256xf32>
    %5 = arith.addf %2, %4 : vector<4x256xf32>
    %cst_5 = arith.constant 0.000000e+00 : f32
    %6 = vector.broadcast %cst_5 : f32 to vector<4x256xf32>
    %7 = arith.maximumf %5, %6 : vector<4x256xf32>
    %8 = arith.truncf %7 : vector<4x256xf32> to vector<4x256xbf16>
    %c0_6 = arith.constant 0 : index
    %c0_7 = arith.constant 0 : index
    %9 = vector.load %arg3[%c0_6, %c0_7] : memref<512x128xbf16, #tpu.memory_space<vmem>>, vector<256x128xbf16>
    %cst_8 = arith.constant dense<0.000000e+00> : vector<4x128xf32>
    %10 = tpu.matmul %8, %9, %cst_8 {dimension_numbers = #tpu.dot_dimension_numbers<[1], [0], [0], [1], [0, 0, 1, 1], [], []>} : vector<4x256xbf16>, vector<256x128xbf16>, vector<4x128xf32> -> vector<4x128xf32>
    %c1 = arith.constant 1 : index
    %c0_9 = arith.constant 0 : index
    %11 = vector.load %arg4[%c1, %c0_9] : memref<4x256xf32, #tpu.memory_space<vmem>>, vector<1x128xf32>
    %12 = vector.broadcast %11 : vector<1x128xf32> to vector<4x128xf32>
    %13 = arith.addf %10, %12 : vector<4x128xf32>
    %cst_10 = arith.constant 0.000000e+00 : f32
    %14 = vector.broadcast %cst_10 : f32 to vector<4x128xf32>
    %15 = arith.maximumf %13, %14 : vector<4x128xf32>
    %16 = arith.truncf %15 : vector<4x128xf32> to vector<4x128xbf16>
    %c256 = arith.constant 256 : index
    %c0_11 = arith.constant 0 : index
    %17 = vector.load %arg3[%c256, %c0_11] : memref<512x128xbf16, #tpu.memory_space<vmem>>, vector<128x128xbf16>
    %cst_12 = arith.constant dense<0.000000e+00> : vector<4x128xf32>
    %18 = tpu.matmul %16, %17, %cst_12 {dimension_numbers = #tpu.dot_dimension_numbers<[1], [0], [0], [1], [0, 0, 1, 1], [], []>} : vector<4x128xbf16>, vector<128x128xbf16>, vector<4x128xf32> -> vector<4x128xf32>
    %c2 = arith.constant 2 : index
    %c0_13 = arith.constant 0 : index
    %19 = vector.load %arg4[%c2, %c0_13] : memref<4x256xf32, #tpu.memory_space<vmem>>, vector<1x128xf32>
    %20 = vector.broadcast %19 : vector<1x128xf32> to vector<4x128xf32>
    %21 = arith.addf %18, %20 : vector<4x128xf32>
    %cst_14 = arith.constant 0.000000e+00 : f32
    %22 = vector.broadcast %cst_14 : f32 to vector<4x128xf32>
    %23 = arith.maximumf %21, %22 : vector<4x128xf32>
    %24 = arith.truncf %23 : vector<4x128xf32> to vector<4x128xbf16>
    %c384 = arith.constant 384 : index
    %c0_15 = arith.constant 0 : index
    %25 = vector.load %arg3[%c384, %c0_15] : memref<512x128xbf16, #tpu.memory_space<vmem>>, vector<128x128xbf16>
    %cst_16 = arith.constant dense<0.000000e+00> : vector<4x128xf32>
    %26 = tpu.matmul %24, %25, %cst_16 {dimension_numbers = #tpu.dot_dimension_numbers<[1], [0], [0], [1], [0, 0, 1, 1], [], []>} : vector<4x128xbf16>, vector<128x128xbf16>, vector<4x128xf32> -> vector<4x128xf32>
    %c3 = arith.constant 3 : index
    %c0_17 = arith.constant 0 : index
    %27 = vector.load %arg4[%c3, %c0_17] : memref<4x256xf32, #tpu.memory_space<vmem>>, vector<1x128xf32>
    %28 = vector.broadcast %27 : vector<1x128xf32> to vector<4x128xf32>
    %29 = arith.addf %26, %28 : vector<4x128xf32>
    %30 = tpu.iota {dimensions = array<i32: 1>} : vector<4x128xi32>
    %c9_i32 = arith.constant 9 : i32
    %31 = vector.broadcast %c9_i32 : i32 to vector<4x128xi32>
    %32 = arith.cmpi slt, %30, %31 : vector<4x128xi32>
    %cst_18 = arith.constant -1.000000e+30 : f32
    %33 = vector.broadcast %cst_18 : f32 to vector<4x128xf32>
    %34 = arith.select %32, %29, %33 : vector<4x128xi1>, vector<4x128xf32>
    %cst_19 = arith.constant dense<0xFF800000> : vector<4xf32>
    %35 = vector.multi_reduction <maximumf>, %34, %cst_19 [1] : vector<4x128xf32> to vector<4xf32>
    %36 = vector.shape_cast %35 : vector<4xf32> to vector<4x1xf32>
    %37 = vector.broadcast %36 : vector<4x1xf32> to vector<4x128xf32>
    %38 = arith.subf %34, %37 : vector<4x128xf32>
    %39 = math.exp %38 : vector<4x128xf32>
    %cst_20 = arith.constant dense<0.000000e+00> : vector<4xf32>
    %40 = vector.multi_reduction <add>, %39, %cst_20 [1] : vector<4x128xf32> to vector<4xf32>
    %41 = vector.shape_cast %40 : vector<4xf32> to vector<4x1xf32>
    %42 = tpu.reciprocal %41 {approx = true} : vector<4x1xf32> -> vector<4x1xf32>
    %43 = vector.broadcast %42 : vector<4x1xf32> to vector<4x128xf32>
    %44 = arith.mulf %39, %43 : vector<4x128xf32>
    %45 = math.tanh %29 : vector<4x128xf32>
    %c9_i32_21 = arith.constant 9 : i32
    %46 = vector.broadcast %c9_i32_21 : i32 to vector<4x128xi32>
    %47 = arith.cmpi slt, %30, %46 : vector<4x128xi32>
    %c9_i32_22 = arith.constant 9 : i32
    %48 = vector.broadcast %c9_i32_22 : i32 to vector<4x128xi32>
    %49 = arith.cmpi eq, %30, %48 : vector<4x128xi32>
    %cst_23 = arith.constant 0.000000e+00 : f32
    %50 = vector.broadcast %cst_23 : f32 to vector<4x128xf32>
    %51 = arith.select %49, %45, %50 : vector<4x128xi1>, vector<4x128xf32>
    %52 = arith.select %47, %44, %51 : vector<4x128xi1>, vector<4x128xf32>
    %c0_24 = arith.constant 0 : index
    %c0_25 = arith.constant 0 : index
    %53 = vector.load %arg5[%c0_24, %c0_25] : memref<4x128xf32, #tpu.memory_space<vmem>>, vector<4x128xf32>
    tpu.vector_store %arg5[%c0_24, %c0_25], %52 {strides = array<i32>} : memref<4x128xf32, #tpu.memory_space<vmem>>, vector<4x128xf32>,
    return
  }
  func.func @transform_0(%arg0: i32) -> (i32, i32) {
    %c0_i32 = arith.constant 0 : i32
    %c0_i32_0 = arith.constant 0 : i32
    return %arg0, %c0_i32 : i32, i32
  }
  func.func @transform_1(%arg0: i32) -> (i32, i32) {
    %c0_i32 = arith.constant 0 : i32
    %c0_i32_0 = arith.constant 0 : i32
    %c0_i32_1 = arith.constant 0 : i32
    return %c0_i32, %c0_i32_0 : i32, i32
  }
  func.func @transform_2(%arg0: i32) -> (i32, i32) {
    %c0_i32 = arith.constant 0 : i32
    %c0_i32_0 = arith.constant 0 : i32
    %c0_i32_1 = arith.constant 0 : i32
    return %c0_i32, %c0_i32_0 : i32, i32
  }
  func.func @transform_3(%arg0: i32) -> (i32, i32) {
    %c0_i32 = arith.constant 0 : i32
    %c0_i32_0 = arith.constant 0 : i32
    %c0_i32_1 = arith.constant 0 : i32
    return %c0_i32, %c0_i32_0 : i32, i32
  }
  func.func @transform_4(%arg0: i32) -> (i32, i32) {
    %c0_i32 = arith.constant 0 : i32
    %c0_i32_0 = arith.constant 0 : i32
    return %arg0, %c0_i32 : i32, i32
  }
}

</mosaic_0001>

<bundles_post_ra>
// kernel: _run_pallas.1
= control target key start
LH: loop header
LB: loop body
LE: loop exit
PB: predicated region body
PF: predicated region fallthrough
CT: control target
= control target key end

     0   :  { %9 = vsyncpa [#allocation3], 0  ;;  %s1323_s0 = inlined_call_operand.hbm [shape: bf16[4,288], index: 0, kind: input, shape index: {}]   ;;  %s1324_s1 = inlined_call_operand.hbm [shape: bf16[288,256], index: 1, kind: input, shape index: {}]   ;;  %s1325_s2 = inlined_call_operand.hbm [shape: bf16[512,128], index: 2, kind: input, shape index: {}]   ;;  %s1326_s3 = inlined_call_operand.vmem [shape: f32[4,256], index: 3, kind: input, shape index: {}]   ;;  %s1327_s4 = inlined_call_operand.hbm [shape: f32[4,128], index: 4, kind: output, shape index: {}]  }
   0x1   :  { %10 = vsyncpa [#allocation6], 0 }
   0x2   :  { %11 = vsyncpa [#allocation4], 0  ;;  %s1185_s15 = smov [#allocation5]   ;;  %s1091_s19 = scalar_lea.hbm %s1324_s1, 4608 }
   0x3   :  { %s27_s16 = sshll.u32 %s1185_s15, 4  ;;  %p1092_p0 = scmp.ne.s32.totalorder %s1324_s1, %s1091_s19  ;;  %s28_s16 = int_to_ptr.vmem [resolvable:$true] %s27_s16 }
   0x4   :  { %p1095_p1 = scmp.lt.u32.totalorder %s1091_s19, %s1324_s1 }
   0x6   :  { %p1097_p2 = pnand %p1095_p1, %p1092_p0 }
   0x8   :  { %1100 = shalt.err (!%p1097_p2)
}
   0x9   :  { %s1101_s24 = scalar_lea.vmem %s28_s16, 4608  ;;  %p1106_p4 = scmp.lt.s32.totalorder %s28_s16, %s28_s16 }
   0xa   :  { %p1102_p3 = scmp.ne.s32.totalorder %s28_s16, %s1101_s24  ;;  %p1107_p5 = scmp.lt.s32.totalorder %s1101_s24, %s1101_s24 }
   0xc   :  { %p1108_p6 = por %p1107_p5, %p1106_p4 }
   0xe   :  { %p1109_p7 = pnand %p1108_p6, %p1102_p3 }
  0x10   :  { %1112 = shalt.err (!%p1109_p7)
}
  0x11   :  { %s1186_s25 = smov 128   ;;  %s1187_s26 = smov 8  }
  0x12   :  { %33 = dma.hbm_to_vmem [thread:$0]  %s1324_s1, 4608, %s28_s16, [#allocation6], %s1186_s25, %s1186_s25, %s1187_s26  }
  0x13   :  { %s1188_s29 = smov [#allocation2]   ;;  %s1189_s5 = smov [#allocation7]  }
  0x14   :  { %s18_s30 = sshll.u32 %s1188_s29, 4  ;;  %s39_s6 = sshll.u32 %s1189_s5, 4  ;;  %s19_s30 = int_to_ptr.vmem [resolvable:$true] %s18_s30  ;;  %s40_s6 = int_to_ptr.vmem [resolvable:$true] %s39_s6 }
  0x15   :  { %s1113_s9 = scalar_lea.hbm %s1323_s0, 96 }
  0x16   :  { %p1114_p8 = scmp.ne.s32.totalorder %s1323_s0, %s1113_s9  ;;  %p1117_p9 = scmp.lt.u32.totalorder %s1113_s9, %s1323_s0 }
  0x18   :  { %p1119_p10 = pnand %p1117_p9, %p1114_p8 }
  0x1a   :  { %1122 = shalt.err (!%p1119_p10)
}
  0x1b   :  { %s1123_s1 = scalar_lea.vmem %s19_s30, 96  ;;  %p1128_p12 = scmp.lt.s32.totalorder %s19_s30, %s19_s30 }
  0x1c   :  { %p1124_p11 = scmp.ne.s32.totalorder %s19_s30, %s1123_s1  ;;  %p1129_p13 = scmp.lt.s32.totalorder %s1123_s1, %s1123_s1 }
  0x1e   :  { %p1130_p0 = por %p1129_p13, %p1128_p12 }
  0x20   :  { %p1131_p1 = pnand %p1130_p0, %p1124_p11 }
  0x22   :  { %1134 = shalt.err (!%p1131_p1)
}
  0x23   :  { %21 = dma.hbm_to_vmem [thread:$0]  %s1323_s0, 96, %s19_s30, [#allocation3]  }
  0x24   :  { %s1135_s18 = scalar_lea.hbm %s1325_s2, 4096 }
  0x25   :  { %p1136_p2 = scmp.ne.s32.totalorder %s1325_s2, %s1135_s18  ;;  %p1139_p3 = scmp.lt.u32.totalorder %s1135_s18, %s1325_s2 }
  0x27   :  { %p1141_p4 = pnand %p1139_p3, %p1136_p2 }
  0x29   :  { %1144 = shalt.err (!%p1141_p4)
}
  0x2a   :  { %s1145_s23 = scalar_lea.vmem %s40_s6, 4096  ;;  %p1150_p6 = scmp.lt.s32.totalorder %s40_s6, %s40_s6 }
  0x2b   :  { %p1146_p5 = scmp.ne.s32.totalorder %s40_s6, %s1145_s23  ;;  %p1151_p7 = scmp.lt.s32.totalorder %s1145_s23, %s1145_s23 }
  0x2d   :  { %p1152_p8 = por %p1151_p7, %p1150_p6 }
  0x2f   :  { %p1153_p9 = pnand %p1152_p8, %p1146_p5 }
  0x31   :  { %1156 = shalt.err (!%p1153_p9)
}
  0x32   :  { %s1190_s0 = smov 64   ;;  %s1191_s24 = smov 4  }
  0x33   :  { %45 = dma.hbm_to_vmem [thread:$0]  %s1325_s2, 4096, %s40_s6, [#allocation6], %s1190_s0, %s1190_s0, %s1191_s24  }
  0x34   :  { %1179 = dma.done.wait [#allocation3], 96  }
  0x35   :  { %1180 = vsyncadd [#allocation3], 4294967200 }
  0x36   :  { %1181 = dma.done.wait [#allocation6], 8704  }
  0x37   :  { %1182 = vsyncadd [#allocation6], 4294958592  ;;  %v998_v0 = vld [vmem:[#allocation5 + $0x4] ss:$8 sps:$4 sm:$0xff]   ;;  %v1000_v1 = vld [vmem:[#allocation5] ss:$8 sps:$4 sm:$0xff]   ;;  %v97_v7 = vlaneseq }
  0x38   :  { %310 = vmatprep.subr.bf16.mxu0 %v998_v0  ;;  %v1001_v2 = vld [vmem:[#allocation5 + $0x14] ss:$8 sps:$4 sm:$0xff]   ;;  %v1003_v3 = vld [vmem:[#allocation5 + $0x10] ss:$8 sps:$4 sm:$0xff]   ;;  %v1004_v4 = vld [vmem:[#allocation5 + $0x24] ss:$8 sps:$4 sm:$0xff]  }
  0x39   :  { %311 = vmatpush1.bf16.msra.mxu0 %v1000_v1  ;;  %v1006_v5 = vld [vmem:[#allocation5 + $0x20] ss:$8 sps:$4 sm:$0xff]   ;;  %v1007_v6 = vld [vmem:[#allocation5 + $0x34] ss:$8 sps:$4 sm:$0xff]   ;;  %v1192_v8 = vmov 1983009808  }
  0x3a   :  { %312 = vmatprep.subr.bf16.mxu0 %v1001_v2  ;;  %v110_v9 = vunpack.c.l.s4 %v1192_v8  ;;  %v1009_v10 = vld [vmem:[#allocation5 + $0x30] ss:$8 sps:$4 sm:$0xff]   ;;  %v1010_v11 = vld [vmem:[#allocation5 + $0x44] ss:$8 sps:$4 sm:$0xff]   ;;  %v1259_v12 = vshrl.u32 %v97_v7, 7  ;;  %v1193_v57 = vmov 0  }
  0x3b   :  { %v1012_v14 = vld [vmem:[#allocation5 + $0x40] ss:$8 sps:$4 sm:$0xff]   ;;  %v1013_v15 = vld [vmem:[#allocation5 + $0x54] ss:$8 sps:$4 sm:$0xff]   ;;  %v1015_v17 = vld [vmem:[#allocation5 + $0x50] ss:$8 sps:$4 sm:$0xff]  }
  0x3c   :  { %v111_v13 = vunpack.c.0.s8 %v110_v9  ;;  %v1016_v18 = vld [vmem:[#allocation5 + $0x64] ss:$8 sps:$4 sm:$0xff]   ;;  %v1264_v19 = vld [vmem:[#allocation2] sm:$0x3f]  ;;  %v1018_v21 = vld [vmem:[#allocation5 + $0x60] ss:$8 sps:$4 sm:$0xff]  }
  0x3d   :  { %313 = vmatpush1.bf16.msra.mxu0 %v1003_v3  ;;  %v1019_v22 = vld [vmem:[#allocation5 + $0x74] ss:$8 sps:$4 sm:$0xff]   ;;  %v1021_v24 = vld [vmem:[#allocation5 + $0x70] ss:$8 sps:$4 sm:$0xff]   ;;  %v1053_v25 = vld [vmem:[#allocation7 + $0x40] sm:$0xff]   ;;  %v108_v58 = vcombine.high %v1264_v19, %v1264_v19  ;;  %vm306_vm0 = vcmask 261120  }
  0x3e   :  { %314 = vmatprep.subr.bf16.mxu0 %v1004_v4  ;;  %v1262_v16 = vsub.s32 %v111_v13, %v1259_v12  ;;  %v1022_v26 = vld [vmem:[#allocation5 + $0x84] ss:$8 sps:$4 sm:$0xff]   ;;  %900 = vmatprep.subr.bf16.mxu1 %v1053_v25  ;;  %v1057_v30 = vld [vmem:[#allocation7 + $0x50] sm:$0xff]   ;;  %v1024_v31 = vld [vmem:[#allocation5 + $0x80] ss:$8 sps:$4 sm:$0xff]   ;;  %v1194_v0 = vmov 0.0  }
  0x3f   :  { %v1054_v27 = vld [vmem:[#allocation7] sm:$0xff]   ;;  %v1055_v28 = vld [vmem:[#allocation7 + $0x48] sm:$0xff]   ;;  %v1025_v32 = vld [vmem:[#allocation5 + $0x94] ss:$8 sps:$4 sm:$0xff]   ;;  %v99_v1 = vsub.s32 0, %v1259_v12  ;;  %v103_v3 = vsub.s32 1, %v1259_v12 }
  0x40   :  { %v1268_v20 = vrot.slane %v1264_v19, %v1262_v16  ;;  %901 = vmatpush3.bf16.msra.mxu1 %v1054_v27  ;;  %v1056_v29 = vld [vmem:[#allocation7 + $0x8] sm:$0xff]   ;;  %v1058_v33 = vld [vmem:[#allocation7 + $0x10] sm:$0xff]   ;;  %v1059_v34 = vld [vmem:[#allocation7 + $0x58] sm:$0xff]   ;;  %v122_v59 = vrot.slane %v108_v58, %v1262_v16  ;;  %vm1195_vm1 = vmmov 0   ;;  %vm795_vm3 = vcmask 1043456  }
  0x41   :  { %315 = vmatpush1.bf16.msra.mxu0 %v1006_v5  ;;  %902 = vmatprep.subr.bf16.mxu1 %v1055_v28  ;;  %v1027_v35 = vld [vmem:[#allocation5 + $0x90] ss:$8 sps:$4 sm:$0xff]   ;;  %v1028_v36 = vld [vmem:[#allocation5 + $0xa4] ss:$8 sps:$4 sm:$0xff]   ;;  %v1030_v39 = vld [vmem:[#allocation5 + $0xa0] ss:$8 sps:$4 sm:$0xff]  }
  0x42   :  { %316 = vmatprep.subr.bf16.mxu0 %v1007_v6  ;;  %v123_v23 = vcombine.high %v1268_v20, %v1268_v20  ;;  %v1060_v37 = vld [vmem:[#allocation7 + $0x18] sm:$0xff]   ;;  %v1061_v38 = vld [vmem:[#allocation7 + $0x60] sm:$0xff]   ;;  %v1063_v42 = vld [vmem:[#allocation7 + $0x68] sm:$0xff]  }
  0x43   :  { %v1031_v40 = vld [vmem:[#allocation5 + $0xb4] ss:$8 sps:$4 sm:$0xff]   ;;  %v1062_v41 = vld [vmem:[#allocation7 + $0x20] sm:$0xff]   ;;  %v1033_v43 = vld [vmem:[#allocation5 + $0xb0] ss:$8 sps:$4 sm:$0xff]  }
  0x44   :  { %342 = vmatprep.mubr.bf16.mxu0 %v123_v23  ;;  %903 = vmatpush3.bf16.msra.mxu1 %v1056_v29  ;;  %v1034_v44 = vld [vmem:[#allocation5 + $0xc4] ss:$8 sps:$4 sm:$0xff]   ;;  %v1036_v46 = vld [vmem:[#allocation5 + $0xc0] ss:$8 sps:$4 sm:$0xff]   ;;  %v1037_v47 = vld [vmem:[#allocation5 + $0xd4] ss:$8 sps:$4 sm:$0xff]  }
  0x45   :  { %317 = vmatpush1.bf16.msra.mxu0 %v1009_v10  ;;  %904 = vmatprep.subr.bf16.mxu1 %v1057_v30  ;;  %v1064_v45 = vld [vmem:[#allocation7 + $0x28] sm:$0xff]   ;;  %v1039_v48 = vld [vmem:[#allocation5 + $0xd0] ss:$8 sps:$4 sm:$0xff]   ;;  %v1043_v51 = vld [vmem:[#allocation5 + $0xf4] ss:$8 sps:$4 sm:$0xff]  }
  0x46   :  { %318 = vmatprep.subr.bf16.mxu0 %v1010_v11  ;;  %v1040_v49 = vld [vmem:[#allocation5 + $0xe4] ss:$8 sps:$4 sm:$0xff]   ;;  %v1042_v50 = vld [vmem:[#allocation5 + $0xe0] ss:$8 sps:$4 sm:$0xff]   ;;  %v1045_v52 = vld [vmem:[#allocation5 + $0xf0] ss:$8 sps:$4 sm:$0xff]  }
  0x47   :  { %v1049_v53 = vld [vmem:[#allocation5 + $0x104] ss:$8 sps:$4 sm:$0xff]   ;;  %v1047_v54 = vld [vmem:[#allocation5 + $0x100] ss:$8 sps:$4 sm:$0xff]   ;;  %v1052_v55 = vld [vmem:[#allocation5 + $0x114] ss:$8 sps:$4 sm:$0xff]  }
  0x48   :  { %905 = vmatpush3.bf16.msra.mxu1 %v1058_v33  ;;  %v1050_v56 = vld [vmem:[#allocation5 + $0x110] ss:$8 sps:$4 sm:$0xff]   ;;  %v1070_v19 = vld [vmem:[#allocation7 + $0x88] sm:$0xff]   ;;  %v1077_v33 = vld [vmem:[#allocation7 + $0xc0] sm:$0xff]  }
  0x49   :  { %319 = vmatpush1.bf16.msra.mxu0 %v1012_v14  ;;  %906 = vmatprep.subr.bf16.mxu1 %v1059_v34  ;;  %v1065_v60 = vld [vmem:[#allocation7 + $0x70] sm:$0xff]   ;;  %v1067_v62 = vld [vmem:[#allocation7 + $0x78] sm:$0xff]  }
  0x4a   :  { %320 = vmatprep.subr.bf16.mxu0 %v1013_v15  ;;  %v1066_v61 = vld [vmem:[#allocation7 + $0x30] sm:$0xff]   ;;  %v1068_v63 = vld [vmem:[#allocation7 + $0x38] sm:$0xff]  }
  0x4b   :  { %v95_v2 = vld [vmem:[%s1326_s3] ss:$4 sm:$0x3] }
  0x4c   :  { %907 = vmatpush3.bf16.msra.mxu1 %v1060_v37  ;;  %v100_v4 = vrot.slane %v95_v2, %v99_v1  ;;  %v104_v5 = vrot.slane %v95_v2, %v103_v3  ;;  %v1071_v12 = vld [vmem:[#allocation7 + $0x90] sm:$0xff]   ;;  %v1080_v37 = vld [vmem:[#allocation7 + $0xd8] sm:$0xff]  }
  0x4d   :  { %321 = vmatpush1.bf16.msra.mxu0 %v1015_v17  ;;  %908 = vmatprep.subr.bf16.mxu1 %v1061_v38  ;;  %v1069_v17 = vld [vmem:[#allocation7 + $0x80] sm:$0xff]   ;;  %v1075_v23 = vld [vmem:[#allocation7 + $0xb0] sm:$0xff]  }
  0x4e   :  { %322 = vmatprep.subr.bf16.mxu0 %v1016_v18  ;;  %v1081_v38 = vld [vmem:[#allocation7 + $0xe0] sm:$0xff]  }
  0x50   :  { %909 = vmatpush3.bf16.msra.mxu1 %v1062_v41  ;;  %v1084_v41 = vld [vmem:[#allocation7 + $0xf8] sm:$0xff]  }
  0x51   :  { %323 = vmatpush1.bf16.msra.mxu0 %v1018_v21  ;;  %910 = vmatprep.subr.bf16.mxu1 %v1063_v42  ;;  %v1073_v21 = vld [vmem:[#allocation7 + $0xa0] sm:$0xff]   ;;  %v882_v42 = vld [vmem:[%s1326_s3 + $0x2] ss:$0 sm:$0xff] }
  0x52   :  { %324 = vmatprep.subr.bf16.mxu0 %v1019_v22  ;;  %v1074_v22 = vld [vmem:[#allocation7 + $0xa8] sm:$0xff]  }
  0x54   :  { %911 = vmatpush3.bf16.msra.mxu1 %v1064_v45 }
  0x55   :  { %325 = vmatpush1.bf16.msra.mxu0 %v1021_v24  ;;  %912 = vmatprep.subr.bf16.mxu1 %v1065_v60  ;;  %v1076_v24 = vld [vmem:[#allocation7 + $0xb8] sm:$0xff]  }
  0x56   :  { %326 = vmatprep.subr.bf16.mxu0 %v1022_v26  ;;  %v865_v26 = vld [vmem:[%s1326_s3 + $0x1] ss:$0 sm:$0xff] }
  0x58   :  { %913 = vmatpush3.bf16.msra.mxu1 %v1066_v61 }
  0x59   :  { %327 = vmatpush1.bf16.msra.mxu0 %v1024_v31  ;;  %914 = vmatprep.subr.bf16.mxu1 %v1067_v62 }
  0x5a   :  { %328 = vmatprep.subr.bf16.mxu0 %v1025_v32 }
  0x5c   :  { %915 = vmatpush3.bf16.msra.mxu1 %v1068_v63 }
  0x5d   :  { %329 = vmatpush1.bf16.msra.mxu0 %v1027_v35  ;;  %940 = vmatprep.subr.bf16.mxu1 %v1194_v0  ;;  %v1078_v35 = vld [vmem:[#allocation7 + $0xc8] sm:$0xff]  }
  0x5e   :  { %330 = vmatprep.subr.bf16.mxu0 %v1028_v36  ;;  %v1079_v36 = vld [vmem:[#allocation7 + $0xd0] sm:$0xff]  }
  0x61   :  { %331 = vmatpush1.bf16.msra.mxu0 %v1030_v39  ;;  %v1082_v39 = vld [vmem:[#allocation7 + $0xe8] sm:$0xff]  }
  0x62   :  { %332 = vmatprep.subr.bf16.mxu0 %v1031_v40  ;;  %v1083_v40 = vld [vmem:[#allocation7 + $0xf0] sm:$0xff]  }
  0x65   :  { %333 = vmatpush1.bf16.msra.mxu0 %v1033_v43 }
  0x66   :  { %334 = vmatprep.subr.bf16.mxu0 %v1034_v44 }
  0x69   :  { %335 = vmatpush1.bf16.msra.mxu0 %v1036_v46 }
  0x6a   :  { %336 = vmatprep.subr.bf16.mxu0 %v1037_v47 }
  0x6d   :  { %337 = vmatpush1.bf16.msra.mxu0 %v1039_v48 }
  0x6e   :  { %338 = vmatprep.subr.bf16.mxu0 %v1040_v49 }
  0x71   :  { %339 = vmatpush1.bf16.msra.mxu0 %v1042_v50  ;;  %v792_v50 = vand.u32 127, %v97_v7 }
  0x72   :  { %340 = vmatprep.subr.bf16.mxu0 %v1043_v51  ;;  %v891_v51 = vld [vmem:[%s1326_s3 + $0x3] ss:$0 sm:$0xff]  ;;  %s1196_s3 = smov [#allocation8]  }
  0x73   :  { %vm793_vm2 = vcmp.lt.s32.totalorder %v792_v50, 9  ;;  %vm808_vm4 = vcmp.eq.s32.totalorder %v792_v50, 9  ;;  %s818_s8 = sshll.u32 %s1196_s3, 4  ;;  %s819_s8 = int_to_ptr.vmem [resolvable:$true] %s818_s8 }
  0x74   :  { %s1157_s9 = scalar_lea.vmem %s819_s8, 64  ;;  %p1162_p11 = scmp.lt.s32.totalorder %s819_s8, %s819_s8 }
  0x75   :  { %341 = vmatpush1.bf16.msra.mxu0 %v1045_v52  ;;  %p1158_p10 = scmp.ne.s32.totalorder %s819_s8, %s1157_s9  ;;  %p1163_p12 = scmp.lt.s32.totalorder %s1157_s9, %s1157_s9 }
  0x76   :  { %351 = vmatprep.subr.bf16.mxu0 %v1049_v53 }
  0x77   :  { %p1164_p13 = por %p1163_p12, %p1162_p11 }
  0x78   :  { %343 = vmatmul.mubr.bf16.vlgmr.msra.gmra.mrb[0].mxu0 %v1268_v20  ;;  %v1072_v20 = vld [vmem:[#allocation7 + $0x98] sm:$0xff]  }
  0x79   :  { %352 = vmatpush1.bf16.msra.mxu0 %v1047_v54  ;;  %383 = vmatprep.mubr.bf16.mxu0 %v1193_v57  ;;  %p1165_p0 = pnand %p1164_p13, %p1158_p10 }
  0x7a   :  { %353 = vmatprep.subr.bf16.mxu0 %v1052_v55 }
  0x7d   :  { %354 = vmatpush1.bf16.msra.mxu0 %v1050_v56 }
  0x84   :  { %864 = vmatmul.mubr.msk.bf16.vlgmr.msra.gmra.mrb[0].mxu0 %vm306_vm0, %v122_v59 }
 0x157   :  { %v385_v6 = vpop.f32.mrb[0].mxu0 }
 0x158   :  { %v980_v8 = vadd.f32 %v385_v6, %v100_v4  ;;  %v387_v9 = vpop.f32.mrb[1].mxu0 }
 0x159   :  { %v981_v10 = vadd.f32 %v387_v9, %v104_v5  ;;  %v389_v11 = vpop.f32.mrb[2].mxu0 }
 0x15a   :  { %v392_v13 = vmax.f32 %v980_v8, 0.0  ;;  %v390_v14 = vpop.f32.mrb[3].mxu0 }
 0x15b   :  { %v393_v15 = vmax.f32 %v981_v10, 0.0 }
 0x15c   :  { %v394_v18 = vpack.c.bf16 %v392_v13, %v392_v13 }
 0x15d   :  { %v395_v16 = vpack.c.bf16 %v393_v15, %v393_v15 }
 0x15f   :  { %561 = vmatprep.mubr.bf16.mxu1 %v395_v16 }
 0x160   :  { %562 = vmatmul.mubr.bf16.vlgmr.msra.gmra.mrb[0].mxu1 %v394_v18 }
 0x161   :  { %941 = vmatpush3.bf16.msra.mxu1 %v1069_v17  ;;  %956 = vmatprep.mubr.msk.bf16.mxu1 %vm1195_vm1, %v1194_v0 }
 0x162   :  { %942 = vmatprep.subr.bf16.mxu1 %v1194_v0 }
 0x165   :  { %943 = vmatpush3.bf16.msra.mxu1 %v1070_v19 }
 0x166   :  { %944 = vmatprep.subr.bf16.mxu1 %v1194_v0 }
 0x169   :  { %945 = vmatpush3.bf16.msra.mxu1 %v1071_v12 }
 0x16a   :  { %946 = vmatprep.subr.bf16.mxu1 %v1194_v0 }
 0x16d   :  { %947 = vmatpush3.bf16.msra.mxu1 %v1072_v20 }
 0x16e   :  { %948 = vmatprep.subr.bf16.mxu1 %v1194_v0 }
 0x171   :  { %949 = vmatpush3.bf16.msra.mxu1 %v1073_v21 }
 0x172   :  { %950 = vmatprep.subr.bf16.mxu1 %v1194_v0 }
 0x175   :  { %951 = vmatpush3.bf16.msra.mxu1 %v1074_v22 }
 0x176   :  { %952 = vmatprep.subr.bf16.mxu1 %v1194_v0 }
 0x179   :  { %953 = vmatpush3.bf16.msra.mxu1 %v1075_v23 }
 0x17a   :  { %954 = vmatprep.subr.bf16.mxu1 %v1194_v0 }
 0x17d   :  { %955 = vmatpush3.bf16.msra.mxu1 %v1076_v24 }
 0x17e   :  { %960 = vmatprep.subr.bf16.mxu1 %v1194_v0 }
 0x233   :  { %v916_v25 = vpop.f32.mrb[0].mxu1 }
 0x234   :  { %v917_v27 = vpop.f32.mrb[1].mxu1 }
 0x235   :  { %v918_v28 = vadd.f32 %v917_v27, %v916_v25  ;;  %v919_v29 = vpop.f32.mrb[2].mxu1 }
 0x236   :  { %v920_v30 = vpop.f32.mrb[3].mxu1 }
 0x237   :  { %v564_v31 = vadd.f32 %v918_v28, %v865_v26 }
 0x239   :  { %v569_v32 = vmax.f32 %v564_v31, 0.0 }
 0x23b   :  { %v570_v34 = vpack.c.bf16 %v569_v32, %v569_v32 }
 0x23d   :  { %957 = vmatmul.mubr.bf16.vlgmr.msra.gmra.mrb[4].mxu1 %v570_v34 }
 0x23e   :  { %961 = vmatpush3.bf16.msra.mxu1 %v1077_v33  ;;  %976 = vmatprep.mubr.msk.bf16.mxu1 %vm1195_vm1, %v1194_v0 }
 0x23f   :  { %962 = vmatprep.subr.bf16.mxu1 %v1194_v0 }
 0x242   :  { %963 = vmatpush3.bf16.msra.mxu1 %v1078_v35 }
 0x243   :  { %964 = vmatprep.subr.bf16.mxu1 %v1194_v0 }
 0x246   :  { %965 = vmatpush3.bf16.msra.mxu1 %v1079_v36 }
 0x247   :  { %966 = vmatprep.subr.bf16.mxu1 %v1194_v0 }
 0x24a   :  { %967 = vmatpush3.bf16.msra.mxu1 %v1080_v37 }
 0x24b   :  { %968 = vmatprep.subr.bf16.mxu1 %v1194_v0 }
 0x24e   :  { %969 = vmatpush3.bf16.msra.mxu1 %v1081_v38 }
 0x24f   :  { %970 = vmatprep.subr.bf16.mxu1 %v1194_v0 }
 0x252   :  { %971 = vmatpush3.bf16.msra.mxu1 %v1082_v39 }
 0x253   :  { %972 = vmatprep.subr.bf16.mxu1 %v1194_v0 }
 0x256   :  { %973 = vmatpush3.bf16.msra.mxu1 %v1083_v40 }
 0x257   :  { %974 = vmatprep.subr.bf16.mxu1 %v1194_v0 }
 0x25a   :  { %975 = vmatpush3.bf16.msra.mxu1 %v1084_v41 }
 0x310   :  { %v674_v43 = vpop.f32.mrb[4].mxu1 }
 0x311   :  { %v675_v44 = vadd.f32 %v882_v42, %v674_v43  ;;  %v958_v45 = vpop.f32.mrb[5].mxu1 }
 0x312   :  { %v677_v46 = vpop.f32.mrb[6].mxu1 }
 0x313   :  { %v680_v47 = vmax.f32 %v675_v44, 0.0  ;;  %v959_v48 = vpop.f32.mrb[7].mxu1 }
 0x315   :  { %v681_v49 = vpack.c.bf16 %v680_v47, %v680_v47 }
 0x317   :  { %977 = vmatmul.mubr.bf16.vlgmr.msra.gmra.mrb[8].mxu1 %v681_v49 }
 0x3ea   :  { %v785_v52 = vpop.f32.mrb[8].mxu1 }
 0x3eb   :  { %v786_v53 = vadd.f32 %v891_v51, %v785_v52  ;;  %v978_v54 = vpop.f32.mrb[9].mxu1 }
 0x3ec   :  { %v788_v55 = vpop.f32.mrb[10].mxu1 }
 0x3ed   :  { %1085 = vtanh.f32 %v786_v53  ;;  %v979_v56 = vpop.f32.mrb[11].mxu1  ;;  %v794_v57 = vsel %vm793_vm2, %v786_v53, -1e+30 }
 0x3ee   :  { %v796_v58 = vsel %vm795_vm3, %v794_v57, -inf }
 0x3ef   :  { %797 = vmax.xlane.f32.xlu0 %v796_v58 }
 0x3f7   :  { %v1086_v59 = vpop.eup %1085 }
 0x3f8   :  { %v809_v60 = vsel %vm808_vm4, %v1086_v59, 0.0 }
 0x47c   :  { %v798_v7 = vpop.xlane.xlu0 %797 }
 0x47d   :  { %v799_v61 = vsub.f32 %v794_v57, %v798_v7 }
 0x47f   :  { %v800_v62 = vmul.f32 1.442695, %v799_v61 }
 0x481   :  { %1087 = vpow2.f32 %v800_v62 }
 0x48b   :  { %v1088_v63 = vpop.eup %1087 }
 0x48c   :  { %v802_v0 = vsel %vm795_vm3, %v1088_v63, 0.0 }
 0x48d   :  { %803 = vadd.xlane.f32.xlu0 %v802_v0 }
 0x51a   :  { %v804_v1 = vpop.xlane.xlu0 %803 }
 0x51b   :  { %1089 = vrcp.f32 %v804_v1 }
 0x525   :  { %v1090_v2 = vpop.eup %1089 }
 0x526   :  { %v806_v3 = vmul.f32 %v1090_v2, %v1088_v63 }
 0x528   :  { %v810_v4 = vsel %vm793_vm2, %v806_v3, %v809_v60 }
 0x529   :  { %811 = vst [vmem:[#allocation8] sm:$0xf] %v810_v4 }
 0x52a   :  { %1168 = shalt.err (!%p1165_p0)
}
 0x52b   :  { %s1169_s12 = scalar_lea.hbm %s1327_s4, 64 }
 0x52c   :  { %p1170_p1 = scmp.ne.s32.totalorder %s1327_s4, %s1169_s12  ;;  %p1173_p2 = scmp.lt.u32.totalorder %s1169_s12, %s1327_s4 }
 0x52e   :  { %p1175_p3 = pnand %p1173_p2, %p1170_p1 }
 0x530   :  { %1178 = shalt.err (!%p1175_p3)
}
 0x531   :  { %821 = dma.vmem_to_hbm [thread:$0]  %s819_s8, 64, %s1327_s4, [#allocation4]  }
 0x532   :  { %1183 = dma.done.wait [#allocation4], 64  }
 0x533   :  { %1184 = vsyncadd [#allocation4], 4294967232 }
 0x534   :  { %825 = vsyncpa [#allocation3], 1 }
 0x535   :  { %826 = vsyncpa [#allocation6], 1 }
 0x536   :  { %827 = vsyncpa [#allocation4], 1 }

</bundles_post_ra>
